<compile_context>
chip_gen: v5e
topology: v5e:2x2
jax: 0.10.0
libtpu: 0.0.40
codegen_flags: <defaults>
</compile_context>

<pallas_src>
import jax
import jax.numpy as jnp
from jax import lax
from jax.experimental import pallas as pl
from jax.experimental.pallas import tpu as pltpu


# --------------------------------------------------------------------------
# Tiling / VMEM budgeting helpers.
# --------------------------------------------------------------------------
def _vmem_capacity_bytes():
    try:
        return int(pltpu.get_tpu_info().vmem_capacity_bytes)
    except Exception:
        return 64 * 1024 * 1024          # conservative fallback (v7x per-core)


def _pick_tiles(B, cube_budget_bytes):
    """Anchor tile ta (sublanes: multiple of 8 or == B) and negative tile tn
    (lanes: 128 or == B), sized so one (ta, B, tn) f32 cube temporary stays
    around the per-generation budget, keeping na >= 2 for megacore when
    possible."""
    tn = 128 if B % 128 == 0 else B
    if B % 8 != 0:
        # TODO(synk): B not a multiple of 8 falls back to a single full-B tile.
        return B, tn
    budget_elems = cube_budget_bytes // 4
    ta = (budget_elems // max(B * tn, 1)) // 8 * 8
    ta = max(8, min(ta, B))
    if B >= 16:
        # Keep at least 2 anchor tiles so the "parallel" grid axis still has
        # work to split across the 2 TensorCores on v7x.
        ta = min(ta, max(8, (B // 2) // 8 * 8))
    while B % ta != 0:
        ta -= 8
    return max(ta, 8), tn


# --------------------------------------------------------------------------
# Fused kernel: distances (MXU, once per anchor tile) + triplet reduction.
# --------------------------------------------------------------------------
def _make_fused_kernel(ta, tn, B, nn, margin, use_softplus,
                       use_gt_than_zero_mean):
    margin = float(margin)
    # Finite sentinels (not inf) so sentinel-sentinel can never produce NaN and
    # invalid terms are exactly 0 (also for the count_nonzero path).
    NEG = -1e30
    POS = 1e30

    def kernel(lab_a_ref, lab_p_ref, x_ref, xt_ref, sqc_ref, sqr_ref,
               out_ref, d_row_ref):
        i = pl.program_id(0)             # anchor-tile index ("parallel")
        j = pl.program_id(1)             # negative-tile index ("arbitrary")

        # ---- distance rows d[a_tile, :] computed once per anchor tile -------
        @pl.when(j == 0)
        def _():
            g = jnp.dot(x_ref[...], xt_ref[...],
                        preferred_element_type=jnp.float32)        # (ta, B)
            d2 = jnp.maximum(sqc_ref[...] + sqr_ref[...] - 2.0 * g, 0.0)
            d_row_ref[...] = jnp.sqrt(d2)

        lab_a = lab_a_ref[...]           # (ta, 1) int32 anchor labels
        lab_p = lab_p_ref[...]           # (1, B)  int32 all labels (positives)

        same_ap = lab_a == lab_p                                        # (ta, B)
        a_idx = lax.broadcasted_iota(jnp.int32, (ta, B), 0) + i * ta
        p_idx = lax.broadcasted_iota(jnp.int32, (ta, B), 1)
        pos_mask = jnp.logical_and(same_ap, a_idx != p_idx)            # (ta, B)

        d_ap = d_row_ref[...]                                          # (ta, B)
        if nn == 1:
            d_an = d_ap                                                # (ta, B==tn)
            lab_n = lab_p
        else:
            start = pl.multiple_of(j * tn, 128)
            d_an = d_row_ref[:, pl.ds(start, tn)]                      # (ta, tn)
            lab_n = lab_p_ref[:, pl.ds(start, tn)]                     # (1, tn)
        neg_mask = lab_a != lab_n                                      # (ta, tn)

        # Sentinel folding: invalid triplets become relu/softplus(<= -1e30) == 0.
        if use_softplus:
            d_ap_m = jnp.where(pos_mask, d_ap, NEG)
        else:
            d_ap_m = jnp.where(pos_mask, d_ap + margin, NEG)           # fold margin: O(B^2)
        d_an_m = jnp.where(neg_mask, d_an, POS)

        raw = d_ap_m[:, :, None] - d_an_m[:, None, :]                  # (ta, B, tn)
        if use_softplus:
            # nn.Softplus(beta=1, threshold=1): identity where raw > 1; clamp
            # the exp argument so the untaken branch cannot overflow.
            t = jnp.where(raw > 1.0, raw,
                          jnp.log1p(jnp.exp(jnp.minimum(raw, 1.0))))
        else:
            t = jnp.maximum(raw, 0.0)

        # Lane-vector partial sums (no per-step cross-lane scalar reduce).
        tot_row = jnp.sum(jnp.sum(t, axis=0), axis=0, keepdims=True)   # (1, tn)

        if use_gt_than_zero_mean:
            # torch.count_nonzero(losses): invalid terms are exactly 0.
            nz = jnp.where(t > 0.0, 1.0, 0.0)
            cnt_row = jnp.sum(jnp.sum(nz, axis=0), axis=0, keepdims=True)
        else:
            # Separable denominator: per-lane contribution pos_count[a] * neg[a, n].
            pos_cnt = jnp.sum(jnp.where(pos_mask, 1.0, 0.0), axis=1,
                              keepdims=True)                           # (ta, 1)
            neg_f = jnp.where(neg_mask, 1.0, 0.0)                      # (ta, tn)
            cnt_row = jnp.sum(pos_cnt * neg_f, axis=0, keepdims=True)  # (1, tn)

        # Single merged lane-dense output block: row 0 = totals, row 1 = counts.
        r = lax.broadcasted_iota(jnp.int32, (8, tn), 0)
        out_ref[...] = jnp.where(r == 0, tot_row,
                                 jnp.where(r == 1, cnt_row, 0.0))

    return kernel


def batch_all_triplet_loss(embeddings, labels, margin=1.0,
                           use_softplus=False, use_gt_than_zero_mean=False,
                           ta=None, tn=None):
    """Pallas implementation of BatchAllTripletLoss.forward."""
    B, D = embeddings.shape
    labels = labels.astype(jnp.int32)
    lab_col = labels.reshape(B, 1)
    lab_row = labels.reshape(1, B)

    # Generation-aware budgets: big cube temporaries on 128 MiB-VMEM chips
    # (v5e/v6e), smaller on v7x (64 MiB per TensorCore).
    cap = _vmem_capacity_bytes()
    big_vmem = cap >= 100 * 1024 * 1024
    cube_budget = (8 if big_vmem else 4) * 1024 * 1024
    vmem_limit = max(32 * 1024 * 1024,
                     min(cap * 3 // 4, cap - 16 * 1024 * 1024))

    auto_ta, auto_tn = _pick_tiles(B, cube_budget)
    ta = auto_ta if ta is None else ta
    tn = auto_tn if tn is None else tn
    assert B % ta == 0 and B % tn == 0, (B, ta, tn)
    na, nn = B // ta, B // tn
    assert nn == 1 or tn % 128 == 0, "multi-tile negative axis must be 128-wide"

    # Wrapper-side prep: pre-transposed embeddings (plain NN MXU matmul in
    # kernel, no in-kernel XLU transpose) and squared norms.
    emb_t = jnp.transpose(embeddings)                      # (D, B)
    xf = embeddings.astype(jnp.float32)
    sq = jnp.sum(xf * xf, axis=1)
    sq_col = sq.reshape(B, 1)
    sq_row = sq.reshape(1, B)

    kernel = _make_fused_kernel(ta, tn, B, nn, margin, use_softplus,
                                use_gt_than_zero_mean)

    out = pl.pallas_call(
        kernel,
        out_shape=jax.ShapeDtypeStruct((na * 8, nn * tn), jnp.float32),
        grid_spec=pltpu.PrefetchScalarGridSpec(
            num_scalar_prefetch=0,
            grid=(na, nn),
            in_specs=[
                pl.BlockSpec((ta, 1), lambda i, j: (i, 0)),   # anchor labels
                pl.BlockSpec((1, B), lambda i, j: (0, 0)),    # all labels (resident)
                pl.BlockSpec((ta, D), lambda i, j: (i, 0)),   # anchor embeddings
                pl.BlockSpec((D, B), lambda i, j: (0, 0)),    # embeddings^T (resident)
                pl.BlockSpec((ta, 1), lambda i, j: (i, 0)),   # ||e||^2 column tile
                pl.BlockSpec((1, B), lambda i, j: (0, 0)),    # ||e||^2 row (resident)
            ],
            out_specs=pl.BlockSpec((8, tn), lambda i, j: (i, j)),
            scratch_shapes=[pltpu.VMEM((ta, B), jnp.float32)],  # d[a_tile, :]
        ),
        compiler_params=pltpu.CompilerParams(
            dimension_semantics=("parallel", "arbitrary"),
            vmem_limit_bytes=int(vmem_limit)),
    )(lab_col, lab_row, embeddings, emb_t, sq_col, sq_row)

    blocks = out.reshape(na, 8, nn * tn)
    total = jnp.sum(blocks[:, 0, :])
    denom = jnp.sum(blocks[:, 1, :])
    # NOTE: denom == 0 (no valid triplets) yields NaN, matching the PyTorch
    # module's 0 / 0 behaviour.
    return total / denom


# --------------------------------------------------------------------------
# Pure-JAX reference mirroring the PyTorch module.
# --------------------------------------------------------------------------
def _reference_loss(embeddings, labels, margin=1.0, use_softplus=False,
                    use_gt_than_zero_mean=False):
    B = embeddings.shape[0]
    diff = embeddings[:, None, :] - embeddings[None, :, :]
    d = jnp.sqrt(jnp.sum(diff * diff, axis=-1))
    same = labels[:, None] == labels[None, :]
    eye = jnp.eye(B, dtype=bool)
    pos = jnp.logical_and(same, jnp.logical_not(eye))
    neg = jnp.logical_not(same)
    raw = d[:, :, None] - d[:, None, :]
    if use_softplus:
        # nn.Softplus(beta=1, threshold=1) as used by the module.
        t = jnp.where(raw > 1.0, raw, jnp.log1p(jnp.exp(jnp.minimum(raw, 1.0))))
    else:
        t = jnp.maximum(raw + margin, 0.0)
    valid = jnp.logical_and(pos[:, :, None], neg[:, None, :])
    masked = jnp.where(valid, t, 0.0)
    total = jnp.sum(masked)
    if use_gt_than_zero_mean:
        denom = jnp.sum((masked > 0).astype(jnp.float32))
    else:
        denom = jnp.sum(valid.astype(jnp.float32))
    return total / denom


if __name__ == "__main__":
    key = jax.random.PRNGKey(0)
    k1, k2, k3 = jax.random.split(key, 3)

    # Case 1: small batch, default flags (single-tile grid).
    B1, D1 = 8, 32
    emb1 = jax.random.normal(k1, (B1, D1), dtype=jnp.float32)
    lab1 = jnp.array([0, 1, 2, 0, 1, 2, 0, 1], dtype=jnp.int32)
    loss1 = jax.block_until_ready(batch_all_triplet_loss(emb1, lab1, margin=1.0))
    ref1 = _reference_loss(emb1, lab1, margin=1.0)
    assert jnp.isfinite(loss1), "loss is not finite"
    assert jnp.allclose(loss1, ref1, rtol=1e-3, atol=1e-3), (loss1, ref1)

    # Case 1b/1c: alternate flag paths on the same inputs.
    loss_gz = jax.block_until_ready(
        batch_all_triplet_loss(emb1, lab1, margin=1.0, use_gt_than_zero_mean=True))
    ref_gz = _reference_loss(emb1, lab1, margin=1.0, use_gt_than_zero_mean=True)
    assert jnp.allclose(loss_gz, ref_gz, rtol=1e-3, atol=1e-3), (loss_gz, ref_gz)

    loss_sp = jax.block_until_ready(
        batch_all_triplet_loss(emb1, lab1, use_softplus=True))
    ref_sp = _reference_loss(emb1, lab1, use_softplus=True)
    assert jnp.allclose(loss_sp, ref_sp, rtol=1e-3, atol=1e-3), (loss_sp, ref_sp)

    # Case 2: multi anchor-tile grid (na=2 over B=16) with explicit ta override.
    B2, D2 = 16, 64
    emb2 = jax.random.normal(k2, (B2, D2), dtype=jnp.float32)
    lab2 = jnp.arange(B2, dtype=jnp.int32) % 4
    loss2 = jax.block_until_ready(
        batch_all_triplet_loss(emb2, lab2, margin=1.0, ta=8))
    ref2 = _reference_loss(emb2, lab2, margin=1.0)
    assert jnp.allclose(loss2, ref2, rtol=1e-3, atol=1e-3), (loss2, ref2)

    # Case 3: auto tiles with negative-axis tiling (B=256 -> tn=128, nn=2),
    # exercising distance-scratch reuse across the inner j axis.
    B3, D3 = 256, 64
    emb3 = jax.random.normal(k3, (B3, D3), dtype=jnp.float32)
    lab3 = jnp.arange(B3, dtype=jnp.int32) % 8
    loss3 = jax.block_until_ready(batch_all_triplet_loss(emb3, lab3, margin=1.0))
    ref3 = _reference_loss(emb3, lab3, margin=1.0)
    assert jnp.allclose(loss3, ref3, rtol=1e-3, atol=1e-3), (loss3, ref3)

    print("KERNEL_OK")
</pallas_src>

<mosaic_0001>
module attributes {stable_mosaic.version = 11 : i64} {
  func.func @kernel(%arg0: i32, %arg1: i32, %arg2: memref<8x1xi32, #tpu.memory_space<vmem>>, %arg3: memref<1x8xi32, #tpu.memory_space<vmem>>, %arg4: memref<8x32xf32, #tpu.memory_space<vmem>>, %arg5: memref<32x8xf32, #tpu.memory_space<vmem>>, %arg6: memref<8x1xf32, #tpu.memory_space<vmem>>, %arg7: memref<1x8xf32, #tpu.memory_space<vmem>>, %arg8: memref<8x8xf32, #tpu.memory_space<vmem>>, %arg9: memref<8x8xf32, #tpu.memory_space<vmem>>) attributes {dimension_semantics = [#tpu.dimension_semantics<parallel>, #tpu.dimension_semantics<arbitrary>], iteration_bounds = array<i64: 1, 1>, scalar_prefetch = 0 : i64, scratch_operands = 1 : i64, tpu.core_type = #tpu.core_type<tc>, window_params = [{transform_indices = @transform_0, window_bounds = array<i64: 8, 1>}, {pipeline_mode = #tpu.pipeline_mode<synchronous>, transform_indices = @transform_1, window_bounds = array<i64: 1, 8>}, {transform_indices = @transform_2, window_bounds = array<i64: 8, 32>}, {pipeline_mode = #tpu.pipeline_mode<synchronous>, transform_indices = @transform_3, window_bounds = array<i64: 32, 8>}, {transform_indices = @transform_4, window_bounds = array<i64: 8, 1>}, {pipeline_mode = #tpu.pipeline_mode<synchronous>, transform_indices = @transform_5, window_bounds = array<i64: 1, 8>}, {transform_indices = @transform_6, window_bounds = array<i64: 8, 8>}]} {
    %c0_i32 = arith.constant 0 : i32
    %0 = arith.cmpi eq, %arg1, %c0_i32 : i32
    %1 = arith.extui %0 : i1 to i32
    %c0_i32_0 = arith.constant 0 : i32
    %2 = arith.cmpi ne, %1, %c0_i32_0 : i32
    scf.if %2 {
      %c0_21 = arith.constant 0 : index
      %c0_22 = arith.constant 0 : index
      %60 = vector.load %arg4[%c0_21, %c0_22] : memref<8x32xf32, #tpu.memory_space<vmem>>, vector<8x32xf32>
      %c0_23 = arith.constant 0 : index
      %c0_24 = arith.constant 0 : index
      %61 = vector.load %arg5[%c0_23, %c0_24] : memref<32x8xf32, #tpu.memory_space<vmem>>, vector<32x8xf32>
      %cst_25 = arith.constant dense<0.000000e+00> : vector<8x8xf32>
      %62 = tpu.matmul %60, %61, %cst_25 {dimension_numbers = #tpu.dot_dimension_numbers<[1], [0], [0], [1], [0, 0, 1, 1], [], []>} : vector<8x32xf32>, vector<32x8xf32>, vector<8x8xf32> -> vector<8x8xf32>
      %c0_26 = arith.constant 0 : index
      %c0_27 = arith.constant 0 : index
      %63 = vector.load %arg6[%c0_26, %c0_27] : memref<8x1xf32, #tpu.memory_space<vmem>>, vector<8x1xf32>
      %c0_28 = arith.constant 0 : index
      %c0_29 = arith.constant 0 : index
      %64 = vector.load %arg7[%c0_28, %c0_29] : memref<1x8xf32, #tpu.memory_space<vmem>>, vector<1x8xf32>
      %65 = vector.broadcast %63 : vector<8x1xf32> to vector<8x8xf32>
      %66 = vector.broadcast %64 : vector<1x8xf32> to vector<8x8xf32>
      %67 = arith.addf %65, %66 : vector<8x8xf32>
      %cst_30 = arith.constant 2.000000e+00 : f32
      %68 = vector.broadcast %cst_30 : f32 to vector<8x8xf32>
      %69 = arith.mulf %68, %62 : vector<8x8xf32>
      %70 = arith.subf %67, %69 : vector<8x8xf32>
      %cst_31 = arith.constant 0.000000e+00 : f32
      %71 = vector.broadcast %cst_31 : f32 to vector<8x8xf32>
      %72 = arith.maximumf %70, %71 : vector<8x8xf32>
      %73 = math.sqrt %72 : vector<8x8xf32>
      %c0_32 = arith.constant 0 : index
      %c0_33 = arith.constant 0 : index
      %74 = vector.load %arg9[%c0_32, %c0_33] : memref<8x8xf32, #tpu.memory_space<vmem>>, vector<8x8xf32>
      tpu.vector_store %arg9[%c0_32, %c0_33], %73 {strides = array<i32>} : memref<8x8xf32, #tpu.memory_space<vmem>>, vector<8x8xf32>,
    } else {
    }
    %c0 = arith.constant 0 : index
    %c0_1 = arith.constant 0 : index
    %3 = vector.load %arg2[%c0, %c0_1] : memref<8x1xi32, #tpu.memory_space<vmem>>, vector<8x1xi32>
    %c0_2 = arith.constant 0 : index
    %c0_3 = arith.constant 0 : index
    %4 = vector.load %arg3[%c0_2, %c0_3] : memref<1x8xi32, #tpu.memory_space<vmem>>, vector<1x8xi32>
    %5 = vector.broadcast %3 : vector<8x1xi32> to vector<8x8xi32>
    %6 = vector.broadcast %4 : vector<1x8xi32> to vector<8x8xi32>
    %7 = arith.cmpi eq, %5, %6 : vector<8x8xi32>
    %8 = tpu.iota {dimensions = array<i32: 0>} : vector<8x8xi32>
    %c8_i32 = arith.constant 8 : i32
    %9 = arith.muli %arg0, %c8_i32 : i32
    %10 = vector.broadcast %9 : i32 to vector<8x8xi32>
    %11 = arith.addi %8, %10 : vector<8x8xi32>
    %12 = tpu.iota {dimensions = array<i32: 1>} : vector<8x8xi32>
    %13 = arith.cmpi ne, %11, %12 : vector<8x8xi32>
    %14 = arith.andi %7, %13 : vector<8x8xi1>
    %c0_4 = arith.constant 0 : index
    %c0_5 = arith.constant 0 : index
    %15 = vector.load %arg9[%c0_4, %c0_5] : memref<8x8xf32, #tpu.memory_space<vmem>>, vector<8x8xf32>
    %16 = vector.broadcast %3 : vector<8x1xi32> to vector<8x8xi32>
    %17 = vector.broadcast %4 : vector<1x8xi32> to vector<8x8xi32>
    %18 = arith.cmpi ne, %16, %17 : vector<8x8xi32>
    %cst = arith.constant 1.000000e+00 : f32
    %19 = vector.broadcast %cst : f32 to vector<8x8xf32>
    %20 = arith.addf %15, %19 : vector<8x8xf32>
    %cst_6 = arith.constant -1.000000e+30 : f32
    %21 = vector.broadcast %cst_6 : f32 to vector<8x8xf32>
    %22 = arith.select %14, %20, %21 : vector<8x8xi1>, vector<8x8xf32>
    %cst_7 = arith.constant 1.000000e+30 : f32
    %23 = vector.broadcast %cst_7 : f32 to vector<8x8xf32>
    %24 = arith.select %18, %15, %23 : vector<8x8xi1>, vector<8x8xf32>
    %25 = vector.shape_cast %22 : vector<8x8xf32> to vector<8x8x1xf32>
    %26 = vector.shape_cast %24 : vector<8x8xf32> to vector<8x1x8xf32>
    %27 = vector.broadcast %25 : vector<8x8x1xf32> to vector<8x8x8xf32>
    %28 = vector.broadcast %26 : vector<8x1x8xf32> to vector<8x8x8xf32>
    %29 = arith.subf %27, %28 : vector<8x8x8xf32>
    %cst_8 = arith.constant 0.000000e+00 : f32
    %30 = vector.broadcast %cst_8 : f32 to vector<8x8x8xf32>
    %31 = arith.maximumf %29, %30 : vector<8x8x8xf32>
    %cst_9 = arith.constant dense<0.000000e+00> : vector<8x8xf32>
    %32 = vector.multi_reduction <add>, %31, %cst_9 [0] : vector<8x8x8xf32> to vector<8x8xf32>
    %cst_10 = arith.constant dense<0.000000e+00> : vector<8xf32>
    %33 = vector.multi_reduction <add>, %32, %cst_10 [0] : vector<8x8xf32> to vector<8xf32>
    %34 = vector.shape_cast %33 : vector<8xf32> to vector<1x8xf32>
    %cst_11 = arith.constant 1.000000e+00 : f32
    %cst_12 = arith.constant 0.000000e+00 : f32
    %35 = vector.broadcast %cst_11 : f32 to vector<8x8xf32>
    %36 = vector.broadcast %cst_12 : f32 to vector<8x8xf32>
    %37 = arith.select %14, %35, %36 : vector<8x8xi1>, vector<8x8xf32>
    %cst_13 = arith.constant dense<0.000000e+00> : vector<8xf32>
    %38 = vector.multi_reduction <add>, %37, %cst_13 [1] : vector<8x8xf32> to vector<8xf32>
    %39 = vector.shape_cast %38 : vector<8xf32> to vector<8x1xf32>
    %cst_14 = arith.constant 1.000000e+00 : f32
    %cst_15 = arith.constant 0.000000e+00 : f32
    %40 = vector.broadcast %cst_14 : f32 to vector<8x8xf32>
    %41 = vector.broadcast %cst_15 : f32 to vector<8x8xf32>
    %42 = arith.select %18, %40, %41 : vector<8x8xi1>, vector<8x8xf32>
    %43 = vector.broadcast %39 : vector<8x1xf32> to vector<8x8xf32>
    %44 = arith.mulf %43, %42 : vector<8x8xf32>
    %cst_16 = arith.constant dense<0.000000e+00> : vector<8xf32>
    %45 = vector.multi_reduction <add>, %44, %cst_16 [0] : vector<8x8xf32> to vector<8xf32>
    %46 = vector.shape_cast %45 : vector<8xf32> to vector<1x8xf32>
    %47 = tpu.iota {dimensions = array<i32: 0>} : vector<8x8xi32>
    %c0_i32_17 = arith.constant 0 : i32
    %48 = vector.broadcast %c0_i32_17 : i32 to vector<8x8xi32>
    %49 = arith.cmpi eq, %47, %48 : vector<8x8xi32>
    %c1_i32 = arith.constant 1 : i32
    %50 = vector.broadcast %c1_i32 : i32 to vector<8x8xi32>
    %51 = arith.cmpi eq, %47, %50 : vector<8x8xi32>
    %cst_18 = arith.constant 0.000000e+00 : f32
    %52 = vector.shape_cast %46 : vector<1x8xf32> to vector<1x8xf32>
    %53 = vector.broadcast %52 : vector<1x8xf32> to vector<8x8xf32>
    %54 = vector.broadcast %cst_18 : f32 to vector<8x8xf32>
    %55 = arith.select %51, %53, %54 : vector<8x8xi1>, vector<8x8xf32>
    %56 = vector.shape_cast %34 : vector<1x8xf32> to vector<1x8xf32>
    %57 = vector.broadcast %56 : vector<1x8xf32> to vector<8x8xf32>
    %58 = arith.select %49, %57, %55 : vector<8x8xi1>, vector<8x8xf32>
    %c0_19 = arith.constant 0 : index
    %c0_20 = arith.constant 0 : index
    %59 = vector.load %arg8[%c0_19, %c0_20] : memref<8x8xf32, #tpu.memory_space<vmem>>, vector<8x8xf32>
    tpu.vector_store %arg8[%c0_19, %c0_20], %58 {strides = array<i32>} : memref<8x8xf32, #tpu.memory_space<vmem>>, vector<8x8xf32>,
    return
  }
  func.func @transform_0(%arg0: i32, %arg1: i32) -> (i32, i32) {
    %c0_i32 = arith.constant 0 : i32
    %c0_i32_0 = arith.constant 0 : i32
    return %arg0, %c0_i32 : i32, i32
  }
  func.func @transform_1(%arg0: i32, %arg1: i32) -> (i32, i32) {
    %c0_i32 = arith.constant 0 : i32
    %c0_i32_0 = arith.constant 0 : i32
    %c0_i32_1 = arith.constant 0 : i32
    return %c0_i32, %c0_i32_0 : i32, i32
  }
  func.func @transform_2(%arg0: i32, %arg1: i32) -> (i32, i32) {
    %c0_i32 = arith.constant 0 : i32
    %c0_i32_0 = arith.constant 0 : i32
    return %arg0, %c0_i32 : i32, i32
  }
  func.func @transform_3(%arg0: i32, %arg1: i32) -> (i32, i32) {
    %c0_i32 = arith.constant 0 : i32
    %c0_i32_0 = arith.constant 0 : i32
    %c0_i32_1 = arith.constant 0 : i32
    return %c0_i32, %c0_i32_0 : i32, i32
  }
  func.func @transform_4(%arg0: i32, %arg1: i32) -> (i32, i32) {
    %c0_i32 = arith.constant 0 : i32
    %c0_i32_0 = arith.constant 0 : i32
    return %arg0, %c0_i32 : i32, i32
  }
  func.func @transform_5(%arg0: i32, %arg1: i32) -> (i32, i32) {
    %c0_i32 = arith.constant 0 : i32
    %c0_i32_0 = arith.constant 0 : i32
    %c0_i32_1 = arith.constant 0 : i32
    return %c0_i32, %c0_i32_0 : i32, i32
  }
  func.func @transform_6(%arg0: i32, %arg1: i32) -> (i32, i32) {
    %c0_i32 = arith.constant 0 : i32
    return %arg0, %arg1 : i32, i32
  }
}

</mosaic_0001>

<bundles_post_ra>
// kernel: tpu_custom_call.1
= control target key start
LH: loop header
LB: loop body
LE: loop exit
PB: predicated region body
PF: predicated region fallthrough
CT: control target
= control target key end

     0   :  { %v297_v2 = vmov 0   ;;  %s409_s0 = inlined_call_operand.vmem [shape: s32[8,1], index: 0, kind: input, shape index: {}]   ;;  %s410_s1 = inlined_call_operand.vmem [shape: s32[1,8], index: 1, kind: input, shape index: {}]   ;;  %s411_s2 = inlined_call_operand.vmem [shape: f32[8,32], index: 2, kind: input, shape index: {}]   ;;  %s412_s3 = inlined_call_operand.vmem [shape: f32[32,8], index: 3, kind: input, shape index: {}]   ;;  %s413_s4 = inlined_call_operand.vmem [shape: f32[8,1], index: 4, kind: input, shape index: {}]   ;;  %s414_s5 = inlined_call_operand.vmem [shape: f32[1,8], index: 5, kind: input, shape index: {}]   ;;  %s415_s6 = inlined_call_operand.hbm [shape: f32[8,8], index: 6, kind: output, shape index: {}]  }
   0x1   :  { %v32_v0 = vld [vmem:[%s412_s3 + $0x18] sm:$0xff]  ;;  %v31_v1 = vld [vmem:[%s412_s3 + $0x10] sm:$0xff]  ;;  %263 = vset.pattern.permute.xlu0 %v297_v2  ;;  %v57_v3 = vld [vmem:[%s413_s4] sm:$0xff] }
   0x2   :  { %49 = vmatpush.msra.mxu0 %v32_v0  ;;  %v30_v4 = vld [vmem:[%s412_s3 + $0x8] sm:$0xff]  ;;  %61 = vperm.xlu0 %263, %v57_v3  }
   0x4   :  { %50 = vmatpush.msra.mxu0 %v31_v1 }
   0x5   :  { %11 = vsyncpa [#allocation4], 0  ;;  %v29_v5 = vld [vmem:[%s412_s3] sm:$0xff]  ;;  %vm33_vm0 = vcmask 261120   ;;  %v92_v8 = vlaneseq  ;;  %v298_v13 = vmov 0.0   ;;  %vm83_vm4 = vcmask 64512  }
   0x6   :  { %51 = vmatpush.msra.mxu0 %v30_v4  ;;  %v28_v6 = vld [vmem:[%s411_s2] sm:$0xff]  ;;  %s250_s13 = sshll.u32 %s415_s6, 4  ;;  %s251_s13 = int_to_ptr.hbm [resolvable:$true] %s250_s13 }
   0x7   :  { %v85_v7 = vld [vmem:[%s409_s0] sm:$0xff]  ;;  %v356_v9 = vshrl.u32 %v92_v8, 7  ;;  %v98_v31 = vand.u32 127, %v92_v8 }
   0x8   :  { %52 = vmatpush.msra.mxu0 %v29_v5  ;;  %v268_v11 = vld [vmem:[%s410_s1] ss:$0 sm:$0xff]  ;;  %s299_s1 = smov [#allocation3]  }
   0x9   :  { %259 = vmatmul.msk.f32.vlgmr.msra.gmra.mxu0 %vm33_vm0, %v28_v6  ;;  %265 = vset.pattern.permute.xlu2 %v356_v9  ;;  %v267_v15 = vld [vmem:[%s414_s5] ss:$0 sm:$0xff]  ;;  %vm99_vm5 = vcmp.ne.s32.totalorder %v356_v9, %v98_v31  ;;  %vm239_vm8 = vcmp.eq.s32.totalorder %v356_v9, 1  ;;  %s248_s5 = sshll.u32 %s299_s1, 4  ;;  %vm238_vm9 = vcmp.eq.s32.totalorder %v356_v9, 0  ;;  %s249_s5 = int_to_ptr.vmem [resolvable:$true] %s248_s5 }
   0xa   :  { %88 = vperm.xlu0 %263, %v85_v7   ;;  %264 = vset.pattern.permute.xlu1 %v356_v9 }
  0x12   :  { %266 = vset.pattern.permute.xlu0 %v356_v9 }
  0x74   :  { %v62_v10 = vpop.permute.xlu0 %61 }
  0x75   :  { %v67_v16 = vadd.f32 %v267_v15, %v62_v10 }
  0x7c   :  { %v89_v12 = vpop.permute.xlu0 %88 }
  0x7d   :  { %vm102_vm1 = vcmp.ne.s32.totalorder %v89_v12, %v268_v11  ;;  %vm91_vm6 = vcmp.eq.s32.totalorder %v89_v12, %v268_v11 }
  0x7e   :  { %v365_v14 = vsel %vm102_vm1, 1.0, %v298_v13  ;;  %vm375_vm7 = vmand %vm91_vm6, %vm99_vm5 }
  0x7f   :  { %v225_v45 = vsel %vm375_vm7, 1.0, %v298_v13 }
  0x80   :  { %v226_v46 = vsel %vm83_vm4, %v225_v45, 0.0 }
  0x86   :  { %v54_v17 = vpop.f32.mrf.mxu0 }
  0x87   :  { %v68_v18 = vmul.f32 2.0, %v54_v17 }
  0x89   :  { %v69_v19 = vsub.f32 %v67_v16, %v68_v18 }
  0x8b   :  { %v70_v20 = vmax.f32 %v69_v19, 0.0 }
  0x8d   :  { %269 = vrsqrt.f32 %v70_v20  ;;  %vm78_vm2 = vcmp.eq.f32.partialorder %v70_v20, inf  ;;  %v81_v28 = vand.u32 2147483648, %v70_v20  ;;  %vm80_vm3 = vcmp.eq.f32.partialorder %v70_v20, 0.0 }
  0x93   :  { %v270_v21 = vpop.eup %269 }
  0x94   :  { %v72_v22 = vmul.f32 %v270_v21, %v70_v20 }
  0x96   :  { %v73_v23 = vmul.f32 %v270_v21, %v72_v22 }
  0x98   :  { %v74_v24 = vmul.f32 0.5, %v73_v23 }
  0x9a   :  { %v75_v25 = vsub.f32 1.5, %v74_v24 }
  0x9c   :  { %v76_v26 = vmul.f32 %v270_v21, %v75_v25 }
  0x9e   :  { %v77_v27 = vmul.f32 %v76_v26, %v70_v20 }
  0xa0   :  { %v79_v29 = vsel %vm78_vm2, %v70_v20, %v77_v27 }
  0xa1   :  { %v82_v30 = vsel %vm80_vm3, %v81_v28, %v79_v29 }
  0xa2   :  { %84 = vst.msk [vmem:[#allocation2] sm:$0xff] %vm83_vm4, %v82_v30 }
  0xa9   :  { %v101_v32 = vld [vmem:[#allocation2] sm:$0xff] }
  0xaa   :  { %v103_v33 = vadd.f32 1.0, %v101_v32  ;;  %v373_v34 = vsel %vm102_vm1, %v101_v32, 1e+30 }
  0xab   :  { %v163_v48 = vrot.slane %v373_v34, 1  ;;  %v164_v52 = vrot.slane %v373_v34, 2  ;;  %v170_v53 = vperm.slane %v373_v34, 0  ;;  %v165_v57 = vrot.slane %v373_v34, 3 }
  0xac   :  { %v104_v36 = vsel %vm375_vm7, %v103_v33, -1e+30  ;;  %v166_v63 = vrot.slane %v373_v34, 4  ;;  %v167_v5 = vrot.slane %v373_v34, 5  ;;  %v168_v16 = vrot.slane %v373_v34, 6 }
  0xad   :  { %v134_v37 = vperm.slane %v104_v36, 4  ;;  %v120_v38 = vperm.slane %v104_v36, 2  ;;  %v106_v39 = vperm.slane %v104_v36, 0  ;;  %v127_v40 = vperm.slane %v104_v36, 3 }
  0xae   :  { %v113_v41 = vperm.slane %v104_v36, 1  ;;  %v148_v42 = vperm.slane %v104_v36, 6  ;;  %v141_v43 = vperm.slane %v104_v36, 5  ;;  %v155_v44 = vperm.slane %v104_v36, 7 }
  0xaf   :  { %139 = vperm.xlu0 %266, %v134_v37   ;;  %125 = vperm.xlu2 %265, %v120_v38   ;;  %v171_v51 = vperm.slane %v163_v48, 0  ;;  %v172_v56 = vperm.slane %v164_v52, 0  ;;  %v173_v62 = vperm.slane %v165_v57, 0  ;;  %v174_v8 = vperm.slane %v166_v63, 0 }
  0xb0   :  { %111 = vperm.xlu1 %264, %v106_v39   ;;  %v175_v13 = vperm.slane %v167_v5, 0  ;;  %v169_v18 = vrot.slane %v373_v34, 7  ;;  %v176_v24 = vperm.slane %v168_v16, 0 }
  0xb2   :  { %v177_v26 = vperm.slane %v169_v18, 0 }
  0xb7   :  { %132 = vperm.xlu2 %265, %v127_v40  }
  0xb8   :  { %118 = vperm.xlu1 %264, %v113_v41  }
  0xbf   :  { %153 = vperm.xlu2 %265, %v148_v42  }
  0xc0   :  { %146 = vperm.xlu1 %264, %v141_v43  }
  0xc8   :  { %160 = vperm.xlu1 %264, %v155_v44  }
  0xe8   :  { %227 = vadd.xlane.f32.xlu2 %v226_v46 }
 0x109   :  { %v126_v49 = vpop.permute.xlu2 %125 }
 0x10a   :  { %v188_v59 = vsub.f32 %v126_v49, %v172_v56 }
 0x10c   :  { %v196_v2 = vmax.f32 %v188_v59, 0.0 }
 0x10e   :  { %v206_v10 = vsel %vm83_vm4, %v196_v2, 0.0 }
 0x111   :  { %v133_v61 = vpop.permute.xlu2 %132 }
 0x112   :  { %v189_v3 = vsub.f32 %v133_v61, %v173_v62 }
 0x114   :  { %v197_v11 = vmax.f32 %v189_v3, 0.0 }
 0x116   :  { %v208_v19 = vsel %vm83_vm4, %v197_v11, 0.0 }
 0x119   :  { %v154_v21 = vpop.permute.xlu2 %153 }
 0x11a   :  { %v192_v27 = vsub.f32 %v154_v21, %v176_v24 }
 0x11c   :  { %v200_v32 = vmax.f32 %v192_v27, 0.0 }
 0x11e   :  { %v214_v34 = vsel %vm83_vm4, %v200_v32, 0.0 }
 0x121   :  { %v140_v6 = vpop.permute.xlu0 %139 }
 0x122   :  { %v112_v47 = vpop.permute.xlu1 %111  ;;  %v190_v12 = vsub.f32 %v140_v6, %v174_v8 }
 0x123   :  { %v186_v55 = vsub.f32 %v112_v47, %v170_v53 }
 0x124   :  { %v198_v20 = vmax.f32 %v190_v12, 0.0 }
 0x125   :  { %v194_v60 = vmax.f32 %v186_v55, 0.0 }
 0x126   :  { %v210_v28 = vsel %vm83_vm4, %v198_v20, 0.0 }
 0x127   :  { %v203_v4 = vsel %vm83_vm4, %v194_v60, 0.0 }
 0x12a   :  { %v119_v50 = vpop.permute.xlu1 %118 }
 0x12b   :  { %v187_v54 = vsub.f32 %v119_v50, %v171_v51 }
 0x12d   :  { %v195_v58 = vmax.f32 %v187_v54, 0.0 }
 0x12f   :  { %v204_v0 = vsel %vm83_vm4, %v195_v58, 0.0 }
 0x130   :  { %v205_v7 = vadd.f32 %v204_v0, %v203_v4 }
 0x132   :  { %v147_v1 = vpop.permute.xlu1 %146  ;;  %v207_v15 = vadd.f32 %v206_v10, %v205_v7 }
 0x133   :  { %v191_v17 = vsub.f32 %v147_v1, %v175_v13 }
 0x134   :  { %v209_v22 = vadd.f32 %v208_v19, %v207_v15 }
 0x135   :  { %v199_v25 = vmax.f32 %v191_v17, 0.0 }
 0x136   :  { %v211_v30 = vadd.f32 %v210_v28, %v209_v22 }
 0x137   :  { %v212_v31 = vsel %vm83_vm4, %v199_v25, 0.0 }
 0x138   :  { %v213_v35 = vadd.f32 %v212_v31, %v211_v30 }
 0x13a   :  { %v161_v23 = vpop.permute.xlu1 %160  ;;  %v215_v37 = vadd.f32 %v214_v34, %v213_v35 }
 0x13b   :  { %v193_v29 = vsub.f32 %v161_v23, %v177_v26 }
 0x13d   :  { %v201_v33 = vmax.f32 %v193_v29, 0.0 }
 0x13f   :  { %v216_v36 = vsel %vm83_vm4, %v201_v33, 0.0 }
 0x140   :  { %v217_v38 = vadd.f32 %v216_v36, %v215_v37 }
 0x142   :  { %v218_v39 = vsel %vm83_vm4, %v217_v38, 0.0 }
 0x143   :  { %v219_v40 = vrot.slane %v218_v39, 4 }
 0x145   :  { %v220_v41 = vadd.f32 %v219_v40, %v218_v39 }
 0x147   :  { %v221_v44 = vrot.slane %v220_v41, 2 }
 0x149   :  { %v222_v48 = vadd.f32 %v221_v44, %v220_v41 }
 0x14b   :  { %v223_v51 = vrot.slane %v222_v48, 1 }
 0x15b   :  { %v228_v42 = vpop.xlane.xlu2 %227 }
 0x15c   :  { %v230_v43 = vmul.f32 %v365_v14, %v228_v42  ;;  %v224_v14 = vadd.f32 %v223_v51, %v222_v48 }
 0x15e   :  { %v231_v45 = vsel %vm83_vm4, %v230_v43, 0.0 }
 0x15f   :  { %v232_v46 = vrot.slane %v231_v45, 4 }
 0x161   :  { %v233_v47 = vadd.f32 %v232_v46, %v231_v45 }
 0x163   :  { %v234_v49 = vrot.slane %v233_v47, 2 }
 0x165   :  { %v235_v50 = vadd.f32 %v234_v49, %v233_v47 }
 0x167   :  { %v236_v52 = vrot.slane %v235_v50, 1 }
 0x169   :  { %v237_v53 = vadd.f32 %v236_v52, %v235_v50 }
 0x16b   :  { %v240_v54 = vsel %vm239_vm8, %v237_v53, 0.0 }
 0x16c   :  { %v241_v55 = vsel %vm238_vm9, %v224_v14, %v240_v54 }
 0x16d   :  { %242 = vst.msk [vmem:[#allocation3] sm:$0xff] %vm83_vm4, %v241_v55 }
 0x16e   :  { %253 = dma.vmem_to_hbm [thread:$0]  %s249_s5, 128, %s251_s13, [#allocation4]  }
 0x16f   :  { %295 = dma.done.wait [#allocation4], 128  }
 0x170   :  { %296 = vsyncadd [#allocation4], 4294967168 }
 0x171   :  { %258 = vsyncpa [#allocation4], 1 }

</bundles_post_ra>
